<compile_context>
chip_gen: v6e
topology: v6e:2x2x1
jax: 0.10.0
libtpu: 0.0.40
codegen_flags: <defaults>
</compile_context>

<pallas_src>
import jax
import jax.numpy as jnp
from jax import lax
from jax.experimental import pallas as pl
from jax.experimental.pallas import tpu as pltpu


def _probe_ce_kernel(h_ref, w_ref, b_ref, lab_ref,       # inputs
                     loss_ref, logits_ref,                # outputs
                     m_ref, l_ref, lbl_ref):              # VMEM scratch (persists across grid)
    """Grid = (P, V//tv, N//tn); V (vocab) is the middle axis, N (tokens) innermost."""
    v = pl.program_id(1)
    n = pl.program_id(2)
    last_v = pl.num_programs(1) - 1

    tn = h_ref.shape[1]
    tv = w_ref.shape[2]
    # Rows of this n-tile inside the persistent (N, 1) per-row scratch.
    rows = pl.ds(pl.multiple_of(n * tn, tn), tn)

    # --- init ------------------------------------------------------------------
    @pl.when(jnp.logical_and(v == 0, n == 0))
    def _init_loss():
        loss_ref[...] = jnp.zeros_like(loss_ref)

    @pl.when(v == 0)
    def _init_rows():
        m_ref[rows] = jnp.full((tn, 1), -jnp.inf, dtype=jnp.float32)
        l_ref[rows] = jnp.zeros((tn, 1), dtype=jnp.float32)
        lbl_ref[rows] = jnp.zeros((tn, 1), dtype=jnp.float32)

    # --- linear probe tile on the MXU: bf16 inputs, f32 accumulation ------------
    s = jnp.dot(h_ref[0], w_ref[0], preferred_element_type=jnp.float32) + b_ref[0]
    logits_ref[0] = s.astype(logits_ref.dtype)        # bf16 writeback (halves HBM store)

    # --- online log-sum-exp update (fused cross-entropy), from the f32 logits ---
    m_prev = m_ref[rows]
    m_new = jnp.maximum(m_prev, jnp.max(s, axis=-1, keepdims=True))
    alpha = jnp.exp(m_prev - m_new)
    l_new = alpha * l_ref[rows] + jnp.sum(jnp.exp(s - m_new), axis=-1, keepdims=True)
    m_ref[rows] = m_new
    l_ref[rows] = l_new

    # --- label-logit gather for this V tile (iota offset by the V-tile start) ---
    labels = lab_ref[...]                               # (tn, 1) int32
    col = v * tv + lax.broadcasted_iota(jnp.int32, s.shape, 1)
    lbl_new = lbl_ref[rows] + jnp.sum(
        jnp.where(col == labels, s, 0.0), axis=-1, keepdims=True)
    lbl_ref[rows] = lbl_new

    # --- finalize this n-tile after the last V tile ------------------------------
    @pl.when(v == last_v)
    def _finalize():
        valid = (labels != -100).astype(jnp.float32)
        per_row = (m_new + jnp.log(l_new) - lbl_new) * valid
        loss_ref[...] = loss_ref[...] + jnp.sum(per_row)


def _pick_tile(total, target, quantum):
    """Largest tile <= target that divides `total` and is a multiple of `quantum`."""
    if total <= target:
        return total
    t = (target // quantum) * quantum
    while t >= quantum:
        if total % t == 0:
            return t
        t -= quantum
    return total


def _vmem_limit_bytes(tn, tv, d, n_rows):
    # double-buffered tiles (x2) plus a x2 fudge for (8,128) lane/sublane padding,
    # plus the lane-padded (N,1) scratch and some headroom.
    per_step = (tn * d * 2          # hidden tile (bf16)
                + d * tv * 2        # weight tile (bf16)
                + tv * 4            # bias tile (f32)
                + tn * tv * 2       # logits tile (bf16)
                + tn * 128 * 4      # labels tile (lane-padded)
                + 8 * 128 * 4)      # loss tile (padded)
    scratch = 3 * n_rows * 128 * 4  # m / l / lbl scratch, lane-padded
    return int(max(4 * per_step + scratch + (4 << 20), 16 << 20))


def probing_forward(hidden_states, probe_w, probe_b, labels, *, tn=None, tv=None):
    """hidden_states: (P, N, D)  probe_w: (P, D, V)  probe_b: (P, 1, V)  labels: (N, 1) int32
    Returns (per_probe_loss (P,), logits (P, N, V) bf16).

    Tile-size guidance at real GPT-2 scale (D=768, V~50k, N>=2048):
      v7x (64 MiB VMEM): tn=256, tv=2048;  v5e/v6e (128 MiB): tn=256-512, tv=4096-8192.
    """
    P, N, D = hidden_states.shape
    V = probe_w.shape[-1]

    if tn is None:
        tn = _pick_tile(N, 256, 8)
    if tv is None:
        tv = _pick_tile(V, 2048, 128)
    assert N % tn == 0 and (tn % 8 == 0 or tn == N)
    assert V % tv == 0 and (tv % 128 == 0 or tv == V)

    # bf16 operands for the MXU; this also halves the dominant HBM weight stream.
    h16 = hidden_states.astype(jnp.bfloat16)
    w16 = probe_w.astype(jnp.bfloat16)
    b32 = probe_b.astype(jnp.float32)
    labels = labels.astype(jnp.int32).reshape(N, 1)

    grid = (P, V // tv, N // tn)   # V middle, N innermost: weight streamed once per probe.

    loss_sum, logits = pl.pallas_call(
        _probe_ce_kernel,
        out_shape=(
            jax.ShapeDtypeStruct((P, 1, 1), jnp.float32),      # per-probe summed CE
            jax.ShapeDtypeStruct((P, N, V), jnp.bfloat16),     # per-probe logits
        ),
        grid_spec=pltpu.PrefetchScalarGridSpec(
            num_scalar_prefetch=0,
            grid=grid,
            in_specs=[
                pl.BlockSpec((1, tn, D), lambda p, v, n: (p, n, 0)),   # hidden tile
                pl.BlockSpec((1, D, tv), lambda p, v, n: (p, 0, v)),   # weight tile (p, v) only
                pl.BlockSpec((1, 1, tv), lambda p, v, n: (p, 0, v)),   # bias tile
                pl.BlockSpec((tn, 1), lambda p, v, n: (n, 0)),         # labels tile
            ],
            out_specs=[
                pl.BlockSpec((1, 1, 1), lambda p, v, n: (p, 0, 0)),    # loss accumulator
                pl.BlockSpec((1, tn, tv), lambda p, v, n: (p, n, v)),  # logits tile
            ],
            scratch_shapes=[
                pltpu.VMEM((N, 1), jnp.float32),   # running max
                pltpu.VMEM((N, 1), jnp.float32),   # running sum-of-exp
                pltpu.VMEM((N, 1), jnp.float32),   # label logit accumulator
            ],
        ),
        compiler_params=pltpu.CompilerParams(
            # P can be split across v7x's two TensorCores; V and N revisit the
            # resident loss block / per-row scratch, so they stay "arbitrary".
            dimension_semantics=("parallel", "arbitrary", "arbitrary"),
            vmem_limit_bytes=_vmem_limit_bytes(tn, tv, D, N),
        ),
    )(h16, w16, b32, labels)

    # CrossEntropyLoss(reduction='mean', ignore_index=-100): divide once, outside
    # the kernel.  NOTE: if every label is -100 this returns 0.0 (PyTorch gives NaN).
    denom = jnp.maximum(jnp.sum(labels != -100).astype(jnp.float32), 1.0)
    losses = loss_sum.reshape(P) / denom
    return losses, logits


def reference_forward(hidden_states, probe_w, probe_b, labels):
    """Pure-JAX reference matching Linear(+bias) + CrossEntropyLoss(ignore_index=-100,
    reduction='mean'), with the same bf16 input rounding the kernel's MXU matmul uses."""
    h = hidden_states.astype(jnp.bfloat16).astype(jnp.float32)
    w = probe_w.astype(jnp.bfloat16).astype(jnp.float32)
    logits = jnp.einsum("pnd,pdv->pnv", h, w) + probe_b
    lab = labels.reshape(-1)
    lse = jax.nn.logsumexp(logits, axis=-1)
    safe = jnp.where(lab == -100, 0, lab)
    gathered = jnp.take_along_axis(logits, safe[None, :, None], axis=-1)[..., 0]
    valid = (lab != -100).astype(jnp.float32)[None, :]
    per_row = (lse - gathered) * valid
    losses = per_row.sum(-1) / jnp.maximum(valid.sum(-1), 1.0)
    return losses, logits


if __name__ == "__main__":
    # Small, module-consistent shapes that still exercise the tiled / online-LSE path.
    B, T = 2, 8                  # batch, sequence length
    D = 32                       # d_model (base_model.config.hidden_size)
    V = 256                      # vocab_size (len(tokenizer))
    probing_layers = [3, 7, 11]  # probed layers of the 12-layer base model
    P = len(probing_layers)
    N = B * T
    has_bias = True

    key = jax.random.PRNGKey(0)
    k_h, k_w, k_b, k_ids = jax.random.split(key, 4)

    # Synthetic hidden states standing in for base_model(..., output_hidden_states=True)
    # at the probed layers, flattened to (P, B*T, D).
    hidden_states = jax.random.normal(k_h, (P, N, D), dtype=jnp.float32)

    # Probe parameters (PyTorch Linear(d_model, vocab) stored transposed: (D, V)).
    probe_w = jax.random.normal(k_w, (P, D, V), dtype=jnp.float32) * 0.02
    probe_b = (jax.random.normal(k_b, (P, 1, V), dtype=jnp.float32) * 0.01
               if has_bias else jnp.zeros((P, 1, V), jnp.float32))

    # Next-token LM-style labels with ignore_index=-100 at sequence ends.
    input_ids = jax.random.randint(k_ids, (B, T), 0, V, dtype=jnp.int32)
    labels_bt = jnp.concatenate(
        [input_ids[:, 1:], jnp.full((B, 1), -100, jnp.int32)], axis=1)   # (B, T)
    labels = labels_bt.reshape(N, 1)

    # tn=8, tv=128 -> grid (3 probes, 2 vocab tiles, 2 token tiles): the online
    # log-sum-exp across V tiles and the V-offset label gather are both exercised.
    losses, logits = probing_forward(hidden_states, probe_w, probe_b, labels,
                                     tn=8, tv=128)
    jax.block_until_ready(losses)
    jax.block_until_ready(logits)

    # Correctness check vs pure-JAX reference (CE compared at f32 precision;
    # logits compared at bf16-output precision).
    ref_losses, ref_logits = reference_forward(hidden_states, probe_w, probe_b, labels)
    assert jnp.allclose(losses, ref_losses, atol=1e-3, rtol=1e-3), (losses, ref_losses)
    assert jnp.allclose(logits.astype(jnp.float32), ref_logits, atol=1e-2, rtol=1e-2)

    # Total probing loss (mean over probes), as a concrete forward() would return.
    total_probing_loss = losses.mean()
    jax.block_until_ready(total_probing_loss)

    print("KERNEL_OK")
</pallas_src>

<mosaic_0001>
module attributes {stable_mosaic.version = 11 : i64} {
  func.func @_probe_ce_kernel(%arg0: i32, %arg1: i32, %arg2: i32, %arg3: memref<1x8x32xbf16, #tpu.memory_space<vmem>>, %arg4: memref<1x32x128xbf16, #tpu.memory_space<vmem>>, %arg5: memref<1x1x128xf32, #tpu.memory_space<vmem>>, %arg6: memref<8x1xi32, #tpu.memory_space<vmem>>, %arg7: memref<1x1x1xf32, #tpu.memory_space<vmem>>, %arg8: memref<1x8x128xbf16, #tpu.memory_space<vmem>>, %arg9: memref<16x1xf32, #tpu.memory_space<vmem>>, %arg10: memref<16x1xf32, #tpu.memory_space<vmem>>, %arg11: memref<16x1xf32, #tpu.memory_space<vmem>>) attributes {dimension_semantics = [#tpu.dimension_semantics<parallel>, #tpu.dimension_semantics<arbitrary>, #tpu.dimension_semantics<arbitrary>], iteration_bounds = array<i64: 3, 2, 2>, scalar_prefetch = 0 : i64, scratch_operands = 3 : i64, tpu.core_type = #tpu.core_type<tc>, window_params = [{transform_indices = @transform_0, window_bounds = array<i64: 1, 8, 32>}, {transform_indices = @transform_1, window_bounds = array<i64: 1, 32, 128>}, {transform_indices = @transform_2, window_bounds = array<i64: 1, 1, 128>}, {transform_indices = @transform_3, window_bounds = array<i64: 8, 1>}, {transform_indices = @transform_4, window_bounds = array<i64: 1, 1, 1>}, {transform_indices = @transform_5, window_bounds = array<i64: 1, 8, 128>}]} {
    %c8_i32 = arith.constant 8 : i32
    %0 = arith.muli %arg2, %c8_i32 : i32
    %1 = tpu.assume_multiple %0, 8 : i32
    %c0_i32 = arith.constant 0 : i32
    %2 = arith.cmpi eq, %arg1, %c0_i32 : i32
    %c0_i32_0 = arith.constant 0 : i32
    %3 = arith.cmpi eq, %arg2, %c0_i32_0 : i32
    %4 = arith.andi %2, %3 : i1
    %5 = arith.extui %4 : i1 to i32
    %c0_i32_1 = arith.constant 0 : i32
    %6 = arith.cmpi ne, %5, %c0_i32_1 : i32
    scf.if %6 {
      %cst_28 = arith.constant 0.000000e+00 : f32
      %62 = vector.broadcast %cst_28 : f32 to vector<1x1x1xf32>
      %c0_29 = arith.constant 0 : index
      %c0_30 = arith.constant 0 : index
      %c0_31 = arith.constant 0 : index
      %63 = vector.load %arg7[%c0_29, %c0_30, %c0_31] : memref<1x1x1xf32, #tpu.memory_space<vmem>>, vector<1x1x1xf32>
      tpu.vector_store %arg7[%c0_29, %c0_30, %c0_31], %62 {strides = array<i32>} : memref<1x1x1xf32, #tpu.memory_space<vmem>>, vector<1x1x1xf32>,
    } else {
    }
    %c0_i32_2 = arith.constant 0 : i32
    %7 = arith.cmpi eq, %arg1, %c0_i32_2 : i32
    %8 = arith.extui %7 : i1 to i32
    %c0_i32_3 = arith.constant 0 : i32
    %9 = arith.cmpi ne, %8, %c0_i32_3 : i32
    scf.if %9 {
      %cst_28 = arith.constant 0xFF800000 : f32
      %62 = vector.broadcast %cst_28 : f32 to vector<8x1xf32>
      %63 = arith.index_cast %1 : i32 to index
      %c0_29 = arith.constant 0 : index
      %64 = vector.load %arg9[%63, %c0_29] : memref<16x1xf32, #tpu.memory_space<vmem>>, vector<8x1xf32>
      tpu.vector_store %arg9[%63, %c0_29], %62 {strides = array<i32>} : memref<16x1xf32, #tpu.memory_space<vmem>>, vector<8x1xf32>,
      %cst_30 = arith.constant 0.000000e+00 : f32
      %65 = vector.broadcast %cst_30 : f32 to vector<8x1xf32>
      %66 = arith.index_cast %1 : i32 to index
      %c0_31 = arith.constant 0 : index
      %67 = vector.load %arg10[%66, %c0_31] : memref<16x1xf32, #tpu.memory_space<vmem>>, vector<8x1xf32>
      tpu.vector_store %arg10[%66, %c0_31], %65 {strides = array<i32>} : memref<16x1xf32, #tpu.memory_space<vmem>>, vector<8x1xf32>,
      %cst_32 = arith.constant 0.000000e+00 : f32
      %68 = vector.broadcast %cst_32 : f32 to vector<8x1xf32>
      %69 = arith.index_cast %1 : i32 to index
      %c0_33 = arith.constant 0 : index
      %70 = vector.load %arg11[%69, %c0_33] : memref<16x1xf32, #tpu.memory_space<vmem>>, vector<8x1xf32>
      tpu.vector_store %arg11[%69, %c0_33], %68 {strides = array<i32>} : memref<16x1xf32, #tpu.memory_space<vmem>>, vector<8x1xf32>,
    } else {
    }
    %c0 = arith.constant 0 : index
    %c0_4 = arith.constant 0 : index
    %c0_5 = arith.constant 0 : index
    %10 = vector.load %arg3[%c0, %c0_4, %c0_5] : memref<1x8x32xbf16, #tpu.memory_space<vmem>>, vector<1x8x32xbf16>
    %11 = vector.shape_cast %10 : vector<1x8x32xbf16> to vector<8x32xbf16>
    %c0_6 = arith.constant 0 : index
    %c0_7 = arith.constant 0 : index
    %c0_8 = arith.constant 0 : index
    %12 = vector.load %arg4[%c0_6, %c0_7, %c0_8] : memref<1x32x128xbf16, #tpu.memory_space<vmem>>, vector<1x32x128xbf16>
    %13 = vector.shape_cast %12 : vector<1x32x128xbf16> to vector<32x128xbf16>
    %cst = arith.constant dense<0.000000e+00> : vector<8x128xf32>
    %14 = tpu.matmul %11, %13, %cst {dimension_numbers = #tpu.dot_dimension_numbers<[1], [0], [0], [1], [0, 0, 1, 1], [], []>} : vector<8x32xbf16>, vector<32x128xbf16>, vector<8x128xf32> -> vector<8x128xf32>
    %c0_9 = arith.constant 0 : index
    %c0_10 = arith.constant 0 : index
    %c0_11 = arith.constant 0 : index
    %15 = vector.load %arg5[%c0_9, %c0_10, %c0_11] : memref<1x1x128xf32, #tpu.memory_space<vmem>>, vector<1x1x128xf32>
    %16 = vector.shape_cast %15 : vector<1x1x128xf32> to vector<1x128xf32>
    %17 = vector.broadcast %16 : vector<1x128xf32> to vector<8x128xf32>
    %18 = arith.addf %14, %17 : vector<8x128xf32>
    %19 = arith.truncf %18 : vector<8x128xf32> to vector<8x128xbf16>
    %c0_12 = arith.constant 0 : index
    %c0_13 = arith.constant 0 : index
    %c0_14 = arith.constant 0 : index
    %20 = vector.load %arg8[%c0_12, %c0_13, %c0_14] : memref<1x8x128xbf16, #tpu.memory_space<vmem>>, vector<1x8x128xbf16>
    %21 = vector.shape_cast %20 : vector<1x8x128xbf16> to vector<8x128xbf16>
    %22 = vector.shape_cast %19 : vector<8x128xbf16> to vector<1x8x128xbf16>
    tpu.vector_store %arg8[%c0_12, %c0_13, %c0_14], %22 {strides = array<i32>} : memref<1x8x128xbf16, #tpu.memory_space<vmem>>, vector<1x8x128xbf16>,
    %23 = arith.index_cast %1 : i32 to index
    %c0_15 = arith.constant 0 : index
    %24 = vector.load %arg9[%23, %c0_15] : memref<16x1xf32, #tpu.memory_space<vmem>>, vector<8x1xf32>
    %cst_16 = arith.constant dense<0xFF800000> : vector<8xf32>
    %25 = vector.multi_reduction <maximumf>, %18, %cst_16 [1] : vector<8x128xf32> to vector<8xf32>
    %26 = vector.shape_cast %25 : vector<8xf32> to vector<8x1xf32>
    %27 = arith.maximumf %24, %26 : vector<8x1xf32>
    %28 = arith.subf %24, %27 : vector<8x1xf32>
    %29 = math.exp %28 : vector<8x1xf32>
    %30 = arith.index_cast %1 : i32 to index
    %c0_17 = arith.constant 0 : index
    %31 = vector.load %arg10[%30, %c0_17] : memref<16x1xf32, #tpu.memory_space<vmem>>, vector<8x1xf32>
    %32 = arith.mulf %29, %31 : vector<8x1xf32>
    %33 = vector.broadcast %27 : vector<8x1xf32> to vector<8x128xf32>
    %34 = arith.subf %18, %33 : vector<8x128xf32>
    %35 = math.exp %34 : vector<8x128xf32>
    %cst_18 = arith.constant dense<0.000000e+00> : vector<8xf32>
    %36 = vector.multi_reduction <add>, %35, %cst_18 [1] : vector<8x128xf32> to vector<8xf32>
    %37 = vector.shape_cast %36 : vector<8xf32> to vector<8x1xf32>
    %38 = arith.addf %32, %37 : vector<8x1xf32>
    %39 = arith.index_cast %1 : i32 to index
    %c0_19 = arith.constant 0 : index
    %40 = vector.load %arg9[%39, %c0_19] : memref<16x1xf32, #tpu.memory_space<vmem>>, vector<8x1xf32>
    tpu.vector_store %arg9[%39, %c0_19], %27 {strides = array<i32>} : memref<16x1xf32, #tpu.memory_space<vmem>>, vector<8x1xf32>,
    %41 = arith.index_cast %1 : i32 to index
    %c0_20 = arith.constant 0 : index
    %42 = vector.load %arg10[%41, %c0_20] : memref<16x1xf32, #tpu.memory_space<vmem>>, vector<8x1xf32>
    tpu.vector_store %arg10[%41, %c0_20], %38 {strides = array<i32>} : memref<16x1xf32, #tpu.memory_space<vmem>>, vector<8x1xf32>,
    %c0_21 = arith.constant 0 : index
    %c0_22 = arith.constant 0 : index
    %43 = vector.load %arg6[%c0_21, %c0_22] : memref<8x1xi32, #tpu.memory_space<vmem>>, vector<8x1xi32>
    %c128_i32 = arith.constant 128 : i32
    %44 = arith.muli %arg1, %c128_i32 : i32
    %45 = tpu.iota {dimensions = array<i32: 1>} : vector<8x128xi32>
    %46 = vector.broadcast %44 : i32 to vector<8x128xi32>
    %47 = arith.addi %46, %45 : vector<8x128xi32>
    %48 = arith.index_cast %1 : i32 to index
    %c0_23 = arith.constant 0 : index
    %49 = vector.load %arg11[%48, %c0_23] : memref<16x1xf32, #tpu.memory_space<vmem>>, vector<8x1xf32>
    %50 = vector.broadcast %43 : vector<8x1xi32> to vector<8x128xi32>
    %51 = arith.cmpi eq, %47, %50 : vector<8x128xi32>
    %cst_24 = arith.constant 0.000000e+00 : f32
    %52 = vector.broadcast %cst_24 : f32 to vector<8x128xf32>
    %53 = arith.select %51, %18, %52 : vector<8x128xi1>, vector<8x128xf32>
    %cst_25 = arith.constant dense<0.000000e+00> : vector<8xf32>
    %54 = vector.multi_reduction <add>, %53, %cst_25 [1] : vector<8x128xf32> to vector<8xf32>
    %55 = vector.shape_cast %54 : vector<8xf32> to vector<8x1xf32>
    %56 = arith.addf %49, %55 : vector<8x1xf32>
    %57 = arith.index_cast %1 : i32 to index
    %c0_26 = arith.constant 0 : index
    %58 = vector.load %arg11[%57, %c0_26] : memref<16x1xf32, #tpu.memory_space<vmem>>, vector<8x1xf32>
    tpu.vector_store %arg11[%57, %c0_26], %56 {strides = array<i32>} : memref<16x1xf32, #tpu.memory_space<vmem>>, vector<8x1xf32>,
    %c1_i32 = arith.constant 1 : i32
    %59 = arith.cmpi eq, %arg1, %c1_i32 : i32
    %60 = arith.extui %59 : i1 to i32
    %c0_i32_27 = arith.constant 0 : i32
    %61 = arith.cmpi ne, %60, %c0_i32_27 : i32
    scf.if %61 {
      %c-100_i32 = arith.constant -100 : i32
      %62 = vector.broadcast %c-100_i32 : i32 to vector<8x1xi32>
      %63 = arith.cmpi ne, %43, %62 : vector<8x1xi32>
      %64 = arith.extui %63 : vector<8x1xi1> to vector<8x1xi32>
      %65 = arith.sitofp %64 : vector<8x1xi32> to vector<8x1xf32>
      %66 = math.log %38 : vector<8x1xf32>
      %67 = arith.addf %27, %66 : vector<8x1xf32>
      %68 = arith.subf %67, %56 : vector<8x1xf32>
      %69 = arith.mulf %68, %65 : vector<8x1xf32>
      %c0_28 = arith.constant 0 : index
      %c0_29 = arith.constant 0 : index
      %c0_30 = arith.constant 0 : index
      %70 = vector.load %arg7[%c0_28, %c0_29, %c0_30] : memref<1x1x1xf32, #tpu.memory_space<vmem>>, vector<1x1x1xf32>
      %71 = vector.shape_cast %69 : vector<8x1xf32> to vector<1x8x1xf32>
      %cst_31 = arith.constant dense<0.000000e+00> : vector<1xf32>
      %72 = vector.multi_reduction <add>, %71, %cst_31 [1, 2] : vector<1x8x1xf32> to vector<1xf32>
      %73 = vector.shape_cast %72 : vector<1xf32> to vector<1x1x1xf32>
      %74 = vector.extract %73[0, 0, 0] : f32 from vector<1x1x1xf32>
      %75 = vector.broadcast %74 : f32 to vector<1x1x1xf32>
      %76 = arith.addf %70, %75 : vector<1x1x1xf32>
      %c0_32 = arith.constant 0 : index
      %c0_33 = arith.constant 0 : index
      %c0_34 = arith.constant 0 : index
      %77 = vector.load %arg7[%c0_32, %c0_33, %c0_34] : memref<1x1x1xf32, #tpu.memory_space<vmem>>, vector<1x1x1xf32>
      tpu.vector_store %arg7[%c0_32, %c0_33, %c0_34], %76 {strides = array<i32>} : memref<1x1x1xf32, #tpu.memory_space<vmem>>, vector<1x1x1xf32>,
    } else {
    }
    return
  }
  func.func @transform_0(%arg0: i32, %arg1: i32, %arg2: i32) -> (i32, i32, i32) {
    %c0_i32 = arith.constant 0 : i32
    %c0_i32_0 = arith.constant 0 : i32
    return %arg0, %arg2, %c0_i32 : i32, i32, i32
  }
  func.func @transform_1(%arg0: i32, %arg1: i32, %arg2: i32) -> (i32, i32, i32) {
    %c0_i32 = arith.constant 0 : i32
    %c0_i32_0 = arith.constant 0 : i32
    return %arg0, %c0_i32, %arg1 : i32, i32, i32
  }
  func.func @transform_2(%arg0: i32, %arg1: i32, %arg2: i32) -> (i32, i32, i32) {
    %c0_i32 = arith.constant 0 : i32
    %c0_i32_0 = arith.constant 0 : i32
    return %arg0, %c0_i32, %arg1 : i32, i32, i32
  }
  func.func @transform_3(%arg0: i32, %arg1: i32, %arg2: i32) -> (i32, i32) {
    %c0_i32 = arith.constant 0 : i32
    %c0_i32_0 = arith.constant 0 : i32
    return %arg2, %c0_i32 : i32, i32
  }
  func.func @transform_4(%arg0: i32, %arg1: i32, %arg2: i32) -> (i32, i32, i32) {
    %c0_i32 = arith.constant 0 : i32
    %c0_i32_0 = arith.constant 0 : i32
    %c0_i32_1 = arith.constant 0 : i32
    return %arg0, %c0_i32, %c0_i32_0 : i32, i32, i32
  }
  func.func @transform_5(%arg0: i32, %arg1: i32, %arg2: i32) -> (i32, i32, i32) {
    %c0_i32 = arith.constant 0 : i32
    return %arg0, %arg2, %arg1 : i32, i32, i32
  }
}

</mosaic_0001>

<bundles_post_ra>
// kernel: tpu_custom_call.1
= control target key start
LH: loop header
LB: loop body
LE: loop exit
PB: predicated region body
PF: predicated region fallthrough
CT: control target
= control target key end

     0   :  { %s1561_s0 = inlined_call_operand.hbm [shape: bf16[3,16,32], index: 0, kind: input, shape index: {}]   ;;  %s1562_s1 = inlined_call_operand.hbm [shape: bf16[3,32,256], index: 1, kind: input, shape index: {}]   ;;  %s1563_s2 = inlined_call_operand.vmem [shape: f32[3,1,256], index: 2, kind: input, shape index: {}]   ;;  %s1564_s3 = inlined_call_operand.vmem [shape: s32[16,1], index: 3, kind: input, shape index: {}]   ;;  %s1565_s4 = inlined_call_operand.vmem [shape: f32[3,1,1], index: 4, kind: output, shape index: {0}]   ;;  %s1566_s5 = inlined_call_operand.hbm [shape: bf16[3,16,256], index: 5, kind: output, shape index: {1}]  }
   0x1   :  { %1585 = sst [smem:[#allocation29_spill]] %s1561_s0 }
   0x2   :  { %1586 = sst [smem:[#allocation30_spill]] %s1562_s1 }
   0x3   :  { %1587 = sst [smem:[#allocation31_spill]] %s1563_s2 }
   0x4   :  { %1588 = sst [smem:[#allocation32_spill]] %s1564_s3 }
   0x5   :  { %1589 = sst [smem:[#allocation33_spill]] %s1565_s4 }
   0x6   :  { %1590 = sst [smem:[#allocation34_spill]] %s1566_s5 }
   0x7   :  { %11 = vsyncpa [#allocation6], 0 }
   0x8   :  { %13 = vsyncpa [#allocation6 + $0x1], 0 }
   0x9   :  { %14 = vsyncpa [#allocation9], 0 }
   0xa   :  { %16 = vsyncpa [#allocation9 + $0x1], 0 }
   0xb   :  { %17 = vsyncpa [#allocation7], 0 }
   0xc   :  { %19 = vsyncpa [#allocation7 + $0x1], 0  ;;  %s1199_s18 = smov 0   ;;  %s1201_s19 = smov 0  }
   0xd   :  { %s1203_s20 = smov 0   ;;  %s1205_s21 = smov 0  }
   0xe   :  { %s1207_s22 = smov 0   ;;  %s1209_s23 = smov 0  }
   0xf   :  { %s1211_s24 = smov 0   ;;  %s1213_s25 = smov 0  }
  0x10   :  { %s1215_s26 = smov 0   ;;  %s1217_s27 = smov 0  }
  0x11   :  { %s1219_s28 = smov 0   ;;  %s1221_s29 = smov 0  }
  0x12   :  { %s1223_s30 = smov 0   ;;  %s1225_s6 = smov 0  }
  0x13   :  { %s1227_s7 = smov 0   ;;  %s1229_s8 = smov 0  }
  0x14 LB: > { %1591 = sst [smem:[#allocation14_spill]] %s1110_s22  ;;  %s1567_s9 = sadd.s32 4294967295, %s1154_s8   ;;  %s1154_s8 = sphi %s1229_s8, %s25_s8   ;;  %s1150_s7 = sphi %s1227_s7, %s1652_s7   ;;  %s1146_s6 = sphi %s1225_s6, %s1651_s6   ;;  %s1142_s30 = sphi %s1223_s30, %s1650_s30   ;;  %s1138_s29 = sphi %s1221_s29, %s1649_s29   ;;  %s1134_s28 = sphi %s1219_s28, %s1648_s28   ;;  %s1130_s27 = sphi %s1217_s27, %s1647_s27   ;;  %s1126_s26 = sphi %s1215_s26, %s1646_s26   ;;  %s1122_s25 = sphi %s1213_s25, %s1645_s25   ;;  %s1118_s24 = sphi %s1211_s24, %s1644_s24   ;;  %s1114_s23 = sphi %s1209_s23, %s1643_s23   ;;  %s1110_s22 = sphi %s1207_s22, %s1642_s22   ;;  %s1106_s21 = sphi %s1205_s21, %s1641_s21   ;;  %s1102_s20 = sphi %s1203_s20, %s1655_s20   ;;  %s1098_s19 = sphi %s1201_s19, %s1654_s19   ;;  %s1094_s18 = sphi %s1199_s18, %s1653_s18  }
  0x15   : > { %1592 = sst [smem:[#allocation15_spill]] %s1114_s23  ;;  %s37_s11 = sadd.s32 1, %s1142_s30 }
  0x16   : > { %1593 = sst [smem:[#allocation16_spill]] %s1122_s25  ;;  %s40_s12 = sadd.s32 1, %s1146_s6 }
  0x17   : > { %1594 = sst [smem:[#allocation17_spill]] %s1126_s26  ;;  %p38_p0 = scmp.ge.s32.totalorder %s37_s11, 2 }
  0x18   : > { %1595 = sst [smem:[#allocation18_spill]] %s1130_s27  ;;  %s44_s13 = sadd.s32 1, %s1150_s7 }
  0x19   : > { %1596 = sst [smem:[#allocation19_spill]] %s1134_s28  ;;  %p60_p1 = scmp.ne.s32.totalorder %s1126_s26, %s1122_s25 }
  0x1a   : > { %1597 = sst [smem:[#allocation20_spill]] %s1142_s30  ;;  %s1657_s11 = smov (%p38_p0, %s37_s11), 0 }
  0x1b   : > { %1598 = sst [smem:[#allocation21_spill]] %s1146_s6  ;;  %s1659_s12 = smov (!%p38_p0, %s40_s12), %s1146_s6 }
  0x1c   : > { %1599 = sst [smem:[#allocation22_spill]] %s1150_s7  ;;  %s49_s15 = ssub.s32 %s1142_s30, %s1657_s11 }
  0x1d   : > { %1600 = sst [smem:[#allocation23_spill]] %s1657_s11  ;;  %p61_p2 = scmp.eq.s32.totalorder %s1154_s8, 0 }
  0x1e   : > { %p42_p3 = scmp.ge.s32.totalorder %s1659_s12, 2  ;;  %p66_p4 = scmp.ne.s32.totalorder %s1122_s25, %s1118_s24 }
  0x1f   : > { %p1294_p5 = por %p61_p2, %p60_p1  ;;  %p67_p6 = scmp.eq.s32.totalorder %s1567_s9, 0 }
  0x20   : > { %s1661_s12 = smov (%p42_p3, %s1659_s12), 0  ;;  %s1663_s13 = smov (!%p42_p3, %s44_s13), %s1150_s7 }
  0x21   : > { %1602 = sst [smem:[#allocation24_spill]] %s1661_s12  ;;  %p1303_p7 = por %p67_p6, %p66_p4 }
  0x22   : > { %s77_s10 = ssub.s32 %s1146_s6, %s1661_s12  ;;  %p46_p8 = scmp.ge.s32.totalorder %s1663_s13, 3 }
  0x23   : > { %s81_s24 = sadd.s32 1, %s1114_s23  ;;  %p88_p9 = scmp.ne.s32.totalorder %s1114_s23, %s1110_s22 }
  0x24   : > { %p94_p10 = scmp.ne.s32.totalorder %s1110_s22, %s1106_s21  ;;  %s1665_s13 = smov (%p46_p8, %s1663_s13), 0 }
  0x25   : > { %1604 = sst [smem:[#allocation25_spill]] %s1665_s13  ;;  %p1318_p11 = por %p88_p9, %p61_p2 }
  0x26   : > { %p1322_p12 = por %p94_p10, %p67_p6  ;;  %s48_s12 = ssub.s32 %s1150_s7, %s1665_s13 }
  0x27   : > { %s191_s11 = sadd.s32 1, %s1102_s20  ;;  %s50_s21 = sor.u32 %s49_s15, %s48_s12 }
  0x28   : > { %s1606_s14 = scalar_select %p1322_p12, 1, 0 }
  0x29   : > { %s78_s5 = sor.u32 %s77_s10, %s48_s12  ;;  %p51_p13 = scmp.eq.s32.totalorder %s50_s21, 0 }
  0x2a   : > { %p79_p0 = scmp.eq.s32.totalorder %s78_s5, 0  ;;  %s188_s3 = sor.u32 %s77_s10, %s50_s21 }
  0x2b   : > { %p201_p1 = scmp.ne.s32.totalorder %s1102_s20, %s1098_s19  ;;  %s1607_s2 = sadd.s32 1, %s1126_s26 }
  0x2c   : > { %s1334_s4 = scalar_select %p51_p13, %s1126_s26, %s1607_s2  }
  0x2d   : > { %s1337_s27 = scalar_select %p79_p0, %s1114_s23, %s81_s24  }
  0x2e   : > { %1608 = sst [smem:[#allocation26_spill]] %s1334_s4  ;;  %p189_p2 = scmp.eq.s32.totalorder %s188_s3, 0 }
  0x2f   : > { %1609 = sst [smem:[#allocation27_spill]] %s1337_s27  ;;  %s1610_s28 = sadd.s32 4294967295, %s1154_s8  }
  0x30   : > { %p202_p3 = scmp.eq.s32.totalorder %s1610_s28, 11  ;;  %p207_p4 = scmp.ne.s32.totalorder %s1098_s19, %s1094_s18 }
  0x31   : > { %s1611_s13 = sadd.s32 4294967294, %s1154_s8   ;;  %p784_p10 = scmp.lt.s32.totalorder %s1154_s8, 12 }
  0x32   : > { %p208_p6 = scmp.eq.s32.totalorder %s1611_s13, 11  ;;  %p1348_p8 = por %p202_p3, %p201_p1 }
  0x33   : > { %s1346_s12 = scalar_select %p189_p2, %s1102_s20, %s191_s11  }
  0x34   : > { %s1613_s5 = scalar_select %p1348_p8, 1, 0 }
  0x35   : > { %1612 = sst [smem:[#allocation28_spill]] %s1346_s12  ;;  %p1352_p9 = por %p208_p6, %p207_p4 }
  0x36   : > { %s228_s3 = sand.u32 1, %s1126_s26   ;;  %s728_s28 = sshll.u32 %s1150_s7, 1 }
  0x37   : > { %s1614_s2 = scalar_select %p1352_p9, 1, 0 }
  0x38   : > { %s727_s10 = sshll.u32 %s228_s3, 2  ;;  %s237_s15 = sadd.s32 %s1142_s30, %s728_s28 }
  0x39   : > { %s729_s24 = sshll.u32 %s237_s15, 6  ;;  %s232_s21 = scalar_lea.vmem [#allocation5], %s727_s10 }
  0x3a   : > { %s241_s13 = sshll.u32 %s232_s21, 4  ;;  %s1615_s0 = sld [smem:[#allocation29_spill]]  ;;  %s242_s13 = int_to_ptr.vmem [resolvable:$true] %s241_s13 }
  0x3b   : > { %p1365_p13 = pnand %p784_p10, %p1294_p5  ;;  %p1371_p0 = pnand %p784_p10, %p1318_p11 }
  0x3c   : > { %p733_p1 = scmp.ge.s32.totalorder %s1154_s8, 1  ;;  %p285_p2 = scmp.lt.s32.totalorder %s1154_s8, 13 }
  0x3d   : > { %s229_s28 = scalar_lea.sflag [#allocation6], %s228_s3  ;;  %p936_p3 = pneg %p1365_p13 }
  0x3e   : > { %s947_s10 = scalar_lea.vmem %s242_s13, 64  ;;  %s1156_s4 = smov [#allocation5]  }
  0x3f   : > { %p948_p4 = scmp.ne.s32.totalorder %s242_s13, %s947_s10  ;;  %s952_s16 = sshll.u32 %s1156_s4, 4  ;;  %s953_s16 = int_to_ptr.vmem [resolvable:$false] %s952_s16 }
  0x40   : > { %s239_s27 = scalar_lea.hbm %s1615_s0, %s729_s24  ;;  %s954_s15 = scalar_lea.vmem %s953_s16, 128 }
  0x41   : > { %p950_p6 = pnand %p948_p4, %p936_p3  ;;  %p955_p5 = scmp.lt.s32.totalorder %s242_s13, %s953_s16 }
  0x42   : > { %p956_p8 = scmp.lt.s32.totalorder %s954_s15, %s947_s10 }
  0x43   : > { %p951_p9 = pneg %p950_p6 }
  0x44   : > { %p957_p12 = por %p956_p8, %p955_p5 }
  0x46   : > { %p958_p11 = pnand %p957_p12, %p951_p9 }
  0x48   : > { %961 = shalt.err (!%p958_p11)
}
  0x49   : > { %776 = dma.hbm_to_vmem [thread:$0]  (!%p1365_p13), %s239_s27, 64, %s242_s13, %s229_s28  }
  0x4a   : > { %p1385_p10 = pnand %p733_p1, %p285_p2  ;;  %s248_s3 = sand.u32 1, %s1114_s23  }
  0x4b   : > { %s730_s24 = sshll.u32 %s248_s3, 4  ;;  %s731_s21 = sshll.u32 %s1150_s7, 3 }
  0x4c   : > { %s257_s11 = sadd.s32 %s1146_s6, %s731_s21  ;;  %s252_s10 = scalar_lea.vmem [#allocation8], %s730_s24 }
  0x4d   : > { %s260_s4 = sshll.u32 %s252_s10, 4  ;;  %s732_s12 = sshll.u32 %s257_s11, 6  ;;  %s261_s4 = int_to_ptr.vmem [resolvable:$true] %s260_s4 }
  0x4e   : > { %s1619_s1 = sld [smem:[#allocation30_spill]]  ;;  %s249_s30 = scalar_lea.sflag [#allocation9], %s248_s3 }
  0x4f   : > { %p964_p12 = pneg %p1371_p0  ;;  %s975_s27 = scalar_lea.vmem %s261_s4, 256 }
  0x50   : > { %p976_p8 = scmp.ne.s32.totalorder %s261_s4, %s975_s27  ;;  %s1157_s13 = smov [#allocation8]  }
  0x51   : > { %s980_s28 = sshll.u32 %s1157_s13, 4  ;;  %s981_s28 = int_to_ptr.vmem [resolvable:$false] %s980_s28 }
  0x52   : > { %p978_p9 = pnand %p976_p8, %p964_p12  ;;  %s982_s7 = scalar_lea.vmem %s981_s28, 512 }
  0x53   : > { %p983_p1 = scmp.lt.s32.totalorder %s261_s4, %s981_s28  ;;  %p984_p2 = scmp.lt.s32.totalorder %s982_s7, %s975_s27 }
  0x54   : > { %s259_s0 = scalar_lea.hbm %s1619_s1, %s732_s12  ;;  %p979_p13 = pneg %p978_p9 }
  0x55   : > { %p985_p3 = por %p984_p2, %p983_p1 }
  0x57   : > { %p986_p4 = pnand %p985_p3, %p979_p13 }
  0x59   : > { %989 = shalt.err (!%p986_p4)
}
  0x5a   : > { %s1158_s24 = smov 128   ;;  %s1159_s21 = smov 64  }
  0x5b   : > { %s1160_s11 = smov 4   ;;  %289 = sbr.rel (%p1385_p10) target bundleno = 1023 (0x3ff), region = 36 }
  0x5c   : > { %779 = dma.hbm_to_vmem [thread:$0]  (!%p1371_p0), %s259_s0, 256, %s261_s4, %s249_s30, %s1158_s24, %s1159_s21, %s1160_s11  }
  0x5d   : > { %s291_s3 = sand.u32 (!%p1385_p10), 1, %s1122_s25  }
  0x5e   : > { %s1402_s10 = sshll.u32 (!%p1385_p10), %s291_s3, 2  ;;  %s292_s12 = scalar_lea.sflag (!%p1385_p10), [#allocation6], %s291_s3 }
  0x60   : > { %1081 = dma.done.wait (%p1303_p7), %s292_s12, 64  }
  0x61   : > { %1083 = vsyncadd (%p1303_p7), %s292_s12, 4294967232  ;;  %s300_s26 = sand.u32 1, %s1110_s22   ;;  %p1620_p0 = scmp.ne.s32.totalorder %s1606_s14, 0 }
  0x62   : > { %s1410_s0 = sshll.u32 %s300_s26, 4  ;;  %s301_s30 = scalar_lea.sflag [#allocation9], %s300_s26 }
  0x63   : > { %1085 = dma.done.wait (%p1620_p0), %s301_s30, 256  }
  0x64   : > { %1087 = vsyncadd (%p1620_p0), %s301_s30, 4294967040  ;;  %s1621_s4 = sld [smem:[#allocation19_spill]]  ;;  %s1580_s17 = sand.u32 1, %s1098_s19  }
  0x65   : > { %s1622_s16 = sld [smem:[#allocation18_spill]]  ;;  %p350_p7 = scmp.lt.s32.totalorder %s1138_s29, 2 }
  0x66   : > { %s1421_s15 = sshll.u32 %s1580_s17, 2  ;;  %s1623_s21 = sld [smem:[#allocation33_spill]] }
  0x67   : > { %s351_s14 = scalar_select %p350_p7, %s1138_s29, 2 }
  0x68   : > { %s1624_s17 = sld [smem:[#allocation31_spill]] }
  0x69   : > { %s737_s13 = sshll.u32 %s351_s14, 1  ;;  %s1625_s23 = sld [smem:[#allocation32_spill]] }
  0x6a   : > { %p352_p6 = scmp.lt.s32.totalorder %s1621_s4, 1  ;;  %p366_p11 = scmp.eq.s32.totalorder %s1621_s4, 0 }
  0x6b   : > { %p357_p5 = scmp.lt.s32.totalorder %s1622_s16, 1  ;;  %s1435_s12 = sshll.u32 %s1622_s16, 3 }
  0x6c   : > { %s353_s27 = scalar_select %p352_p6, %s1621_s4, 1 }
  0x6d   : > { %s1430_s11 = scalar_lea.vmem %s1623_s21, %s351_s14  ;;  %p367_p10 = scmp.eq.s32.totalorder %s1622_s16, 0 }
  0x6e   : > { %s1432_s3 = sadd.s32 %s737_s13, %s353_s27  ;;  %s349_s14 = scalar_lea.vmem [#allocation10], %s1421_s15 }
  0x6f   : > { %s356_s7 = scalar_lea.vmem %s1624_s17, %s1432_s3  ;;  %p368_p12 = pnand %p367_p10, %p366_p11 }
  0x70   : > { %s358_s9 = scalar_select %p357_p5, %s1622_s16, 1 }
  0x71   : > { %371 = sbr.rel (%p368_p12) target bundleno = 120 (0x78), region = 48 }
  0x72   : > { %s738_s1 = sshll.u32 %s358_s9, 3 }
  0x73   : > { %s360_s22 = scalar_lea.vmem %s1625_s23, %s738_s1 }
  0x76   : > { %vm372_vm0 = vcmask 0   ;;  %v1161_v0 = vmov 0.0  }
  0x77   : > { %373 = vst.msk [vmem:[%s1430_s11] sm:$0x1] %vm372_vm0, %v1161_v0 }
  0x78 PF: > { %s1626_s27 = sld [smem:[#allocation19_spill]] }
  0x7e   : > { %p740_p8 = scmp.ne.s32.totalorder %s1626_s27, 0 }
  0x7f   : > { %s377_s9 = scalar_lea.vmem (!%p740_p8), [#allocation2], %s1435_s12  ;;  %s380_s25 = scalar_lea.vmem (!%p740_p8), [#allocation3], %s1435_s12 }
  0x80   : > { %376 = sbr.rel (%p740_p8) target bundleno = 136 (0x88), region = 52  ;;  %s382_s1 = scalar_lea.vmem (!%p740_p8), [#allocation4], %s1435_s12 }
  0x85   : > { %vm378_vm1 = vcmask 7168   ;;  %v1162_v1 = vmov -inf   ;;  %v1163_v2 = vmov 0.0  }
  0x86   : > { %379 = vst.msk [vmem:[%s377_s9] sm:$0xff] %vm378_vm1, %v1162_v1  ;;  %381 = vst.msk [vmem:[%s380_s25] sm:$0xff] %vm378_vm1, %v1163_v2 }
  0x87   : > { %383 = vst.msk [vmem:[%s382_s1] sm:$0xff] %vm378_vm1, %v1163_v2 }
  0x88 PF: > { %s1627_s23 = scalar_lea.vmem [#allocation8], %s1410_s0  ;;  %v1164_v4 = vmov 0.0   ;;  %vm1165_vm2 = vmmov 0   ;;  %v1457_v6 = vld [vmem:[%s360_s22] sm:$0xff]  ;;  %v1166_v7 = vmov 0   ;;  %s1629_s4 = scalar_lea.vmem [#allocation5], %s1402_s10  ;;  %v481_v23 = vlaneseq }
  0x89   : > { %v926_v3 = vld [vmem:[%s1627_s23 + $0x8] sm:$0xff]   ;;  %757 = vmatprep.subr.bf16.mxu0 %v1164_v4  ;;  %s1628_s6 = smov %s1627_s23  ;;  %761 = vmatprep.mubr.msk.bf16.mxu0 %vm1165_vm2, %v1164_v4  ;;  %vm408_vm3 = vcmask 261120   ;;  %s1631_s22 = sld [smem:[#allocation19_spill]]  ;;  %vm476_vm4 = vcmask 7168  }
  0x8a   : > { %758 = vmatpush3.bf16.msra.mxu0 %v926_v3  ;;  %v927_v5 = vld [vmem:[%s1628_s6] sm:$0xff]   ;;  %925 = vset.pattern.permute.xlu1 %v1166_v7  ;;  %v384_v8 = vld [vmem:[%s1629_s4] sm:$0xf]  ;;  %s454_s13 = scalar_lea.vmem [#allocation2], %s1435_s12  ;;  %v482_v24 = vand.u32 127, %v481_v23  ;;  %s485_s28 = scalar_lea.vmem [#allocation4], %s1435_s12 }
  0x8b   : > { %759 = vmatprep.subr.bf16.mxu0 %v1164_v4  ;;  %488 = vperm.xlu1 %925, %v1457_v6   ;;  %v741_v9 = vld [vmem:[%s356_s7] ss:$0 sm:$0xff]  ;;  %s462_s7 = scalar_lea.vmem [#allocation3], %s1435_s12 }
  0x8c   : > { %924 = vset.pattern.permute.xlu0 %v1166_v7 }
  0x8d   : > { %v455_v16 = vld [vmem:[%s454_s13] sm:$0xff] }
  0x8e   : > { %760 = vmatpush3.bf16.msra.mxu0 %v927_v5  ;;  %v463_v32 = vld [vmem:[%s462_s7] sm:$0xff] }
  0x8f   : > { %s745_s10 = sshll.u32 %s1631_s22, 7  ;;  %v486_v36 = vld [vmem:[%s485_s28] sm:$0xff]  ;;  %p746_p9 = scmp.ne.s32.totalorder %s1631_s22, 1 }
  0x90   : > { %v483_v25 = vstv %s745_s10 }
  0x91   : > { %762 = vmatmul.mubr.msk.bf16.vlgmr.msra.gmra.mxu0 %vm408_vm3, %v384_v8  ;;  %v484_v26 = vadd.s32 %v483_v25, %v482_v24 }
 0x106   : > { %v489_v27 = vpop.permute.xlu1 %488 }
 0x107   : > { %vm490_vm5 = vcmp.eq.s32.totalorder %v484_v26, %v489_v27 }
 0x151   : > { %v446_v10 = vpop.f32.mrf.mxu0 }
 0x152   : > { %v447_v11 = vadd.f32 %v741_v9, %v446_v10 }
 0x153   : > { %v763_v12 = vpop.f32.mrf.mxu0 }
 0x154   : > { %v452_v13 = vpack.c.bf16 %v447_v11, %v447_v11  ;;  %456 = vmax.xlane.f32.xlu0 %v447_v11  ;;  %v491_v29 = vsel %vm490_vm5, %v447_v11, 0.0 }
 0x155   : > { %v449_v14 = vpop.f32.mrf.mxu0 }
 0x156   : > { %453 = vst [vmem:[%s349_s14] sm:$0xf] %v452_v13 }
 0x157   : > { %v764_v15 = vpop.f32.mrf.mxu0 }
 0x1dd   : > { %v457_v17 = vpop.xlane.xlu0 %456 }
 0x1de   : > { %v458_v18 = vmax.f32 %v455_v16, %v457_v17 }
 0x1e0   : > { %v459_v19 = vsub.f32 %v455_v16, %v458_v18  ;;  %477 = vst.msk [vmem:[%s454_s13] sm:$0xff] %vm476_vm4, %v458_v18  ;;  %467 = vperm.xlu0 %924, %v458_v18  }
 0x1e2   : > { %v460_v30 = vmul.f32 1.442695, %v459_v19 }
 0x25b   : > { %v468_v20 = vpop.permute.xlu0 %467 }
 0x25c   : > { %v470_v21 = vsub.f32 %v447_v11, %v468_v20 }
 0x25e   : > { %v471_v22 = vmul.f32 1.442695, %v470_v21 }
 0x260   : > { %928 = vpow2.f32 %v471_v22 }
 0x261   : > { %930 = vpow2.f32 %v460_v30 }
 0x26d   : > { %v929_v28 = vpop.eup %928 }
 0x26e   : > { %473 = vadd.xlane.f32.xlu1 %v929_v28  ;;  %v931_v31 = vpop.eup %930 }
 0x26f   : > { %v464_v33 = vmul.f32 %v931_v31, %v463_v32 }
 0x272   : > { %492 = vadd.xlane.f32.xlu1 %v491_v29 }
 0x2f7   : > { %v474_v34 = vpop.xlane.xlu1 %473 }
 0x2f8   : > { %v475_v35 = vadd.f32 %v474_v34, %v464_v33 }
 0x2fa   : > { %478 = vst.msk [vmem:[%s462_s7] sm:$0xff] %vm476_vm4, %v475_v35  ;;  %499 = sbr.rel (%p746_p9) target bundleno = 994 (0x3e2), region = 56 }
 0x2fb   : > { %v493_v37 = vpop.xlane.xlu1 %492 }
 0x2fc   : > { %v494_v38 = vadd.f32 %v493_v37, %v486_v36 }
 0x2fe   : > { %495 = vst.msk [vmem:[%s485_s28] sm:$0xff] %vm476_vm4, %v494_v38 }
 0x2ff   : > { %932 = vlog2.f32 %v475_v35  ;;  %vm500_vm6 = vcmp.ne.s32.totalorder %v1457_v6, 4294967196  ;;  %v1167_v42 = vmov 0.0   ;;  %v508_v54 = vld [vmem:[%s1430_s11] sm:$0x1]  ;;  %vm521_vm7 = vcmask 0  }
 0x300   : > { %v747_v43 = vsel %vm500_vm6, 1.0, %v1167_v42 }
 0x30c   : > { %v933_v39 = vpop.eup %932 }
 0x30d   : > { %v504_v40 = vmul.f32 0.6931472, %v933_v39 }
 0x30f   : > { %v505_v41 = vadd.f32 %v504_v40, %v458_v18 }
 0x311   : > { %v506_v44 = vsub.f32 %v505_v41, %v494_v38 }
 0x313   : > { %v507_v45 = vmul.f32 %v747_v43, %v506_v44 }
 0x315   : > { %v509_v46 = vsel %vm476_vm4, %v507_v45, 0.0 }
 0x316   : > { %510 = vadd.xlane.f32.xlu0 %v509_v46 }
 0x39f   : > { %v511_v47 = vpop.xlane.xlu0 %510 }
 0x3a0   : > { %v512_v48 = vrot.slane %v511_v47, 4 }
 0x3a2   : > { %v513_v49 = vadd.f32 %v512_v48, %v511_v47 }
 0x3a4   : > { %v514_v50 = vrot.slane %v513_v49, 2 }
 0x3a6   : > { %v515_v51 = vadd.f32 %v514_v50, %v513_v49 }
 0x3a8   : > { %v516_v52 = vrot.slane %v515_v51, 1 }
 0x3aa   : > { %v517_v53 = vadd.f32 %v516_v52, %v515_v51 }
 0x3ac   : > { %765 = vpush %v517_v53 }
 0x3dd   : > { %s766_s24 = spop %765 }
 0x3de   : > { %v519_v55 = vstv %s766_s24 }
 0x3df   : > { %v520_v56 = vadd.f32 %v519_v55, %v508_v54 }
 0x3e1   : > { %522 = vst.msk [vmem:[%s1430_s11] sm:$0x1] %vm521_vm7, %v520_v56 }
 0x3e2 PF: > { %s1632_s21 = sld [smem:[#allocation18_spill]]  ;;  %s750_s30 = sshll.u32 %s1138_s29, 2 }
 0x3e3   : > { %s1633_s3 = sld [smem:[#allocation19_spill]]  ;;  %s547_s9 = sshll.u32 %s349_s14, 4  ;;  %s548_s9 = int_to_ptr.vmem [resolvable:$true] %s547_s9 }
 0x3e4   : > { %s1634_s6 = sld [smem:[#allocation34_spill]]  ;;  %s1636_s11 = sand.u32 1, %s1098_s19  }
 0x3e5   : > { %s527_s0 = scalar_lea.sflag [#allocation7], %s1636_s11  ;;  %s990_s17 = scalar_lea.vmem %s548_s9, 64 }
 0x3e6   : > { %p991_p13 = scmp.ne.s32.totalorder %s548_s9, %s990_s17  ;;  %p1637_p1 = scmp.ne.s32.totalorder %s1613_s5, 0 }
 0x3e7   : > { %s1168_s22 = smov [#allocation10]  }
 0x3e8   : > { %s749_s12 = sshll.u32 %s1632_s21, 1  ;;  %p992_p2 = pnand %p991_p13, %p1637_p1 }
 0x3e9   : > { %s541_s26 = sadd.s32 %s1633_s3, %s749_s12  ;;  %s994_s13 = sshll.u32 %s1168_s22, 4  ;;  %s995_s13 = int_to_ptr.vmem [resolvable:$false] %s994_s13 }
 0x3ea   : > { %s543_s27 = sadd.s32 %s750_s30, %s541_s26  ;;  %s1635_s4 = smov %s1634_s6 }
 0x3eb   : > { %s751_s25 = sshll.u32 %s543_s27, 6  ;;  %p993_p3 = pneg %p992_p2 }
 0x3ec   : > { %s545_s16 = scalar_lea.hbm %s1634_s6, %s751_s25  ;;  %s996_s29 = scalar_lea.vmem %s995_s13, 128 }
 0x3ed   : > { %p997_p4 = scmp.lt.s32.totalorder %s548_s9, %s995_s13  ;;  %p998_p0 = scmp.lt.s32.totalorder %s996_s29, %s990_s17 }
 0x3ef   : > { %p999_p7 = por %p998_p0, %p997_p4 }
 0x3f1   : > { %p1000_p6 = pnand %p999_p7, %p993_p3 }
 0x3f3   : > { %1003 = shalt.err (!%p1000_p6)
}
 0x3f4   : > { %s1004_s15 = scalar_lea.hbm %s545_s16, 64  ;;  %s1008_s7 = scalar_lea.hbm %s1635_s4, 768 }
 0x3f5   : > { %p1005_p5 = scmp.ne.s32.totalorder %s545_s16, %s1004_s15  ;;  %p1009_p12 = scmp.lt.s32.totalorder %s545_s16, %s1635_s4 }
 0x3f6   : > { %p1010_p8 = scmp.lt.s32.totalorder %s1008_s7, %s1004_s15 }
 0x3f7   : > { %p1006_p11 = pnand %p1005_p5, %p1637_p1 }
 0x3f8   : > { %p1011_p9 = por %p1010_p8, %p1009_p12 }
 0x3f9   : > { %p1007_p10 = pneg %p1006_p11 }
 0x3fb   : > { %p1012_p13 = pnand %p1011_p9, %p1007_p10 }
 0x3fd   : > { %1015 = shalt.err (!%p1012_p13)
}
 0x3fe   : > { %771 = dma.vmem_to_hbm [thread:$0]  (%p1637_p1), %s548_s9, 64, %s545_s16, %s527_s0  }
 0x3ff PF: > { %p785_p2 = scmp.ge.s32.totalorder %s1154_s8, 2  ;;  %s565_s21 = sand.u32 1, %s1094_s18  }
 0x400   : > { %p1638_p3 = scmp.ne.s32.totalorder %s1614_s2, 0  ;;  %s566_s3 = scalar_lea.sflag [#allocation7], %s565_s21 }
 0x402   : > { %p781_p4 = pnand %p785_p2, %p1638_p3 }
 0x404   : > { %p782_p0 = pneg %p781_p4 }
 0x406   : > { %1089 = dma.done.wait (%p782_p0), %s566_s3, 64  }
 0x407   : > { %1091 = vsyncadd (%p782_p0), %s566_s3, 4294967232  ;;  %s25_s8 = sadd.s32 1, %s1154_s8   ;;  %s1640_s5 = sld [smem:[#allocation28_spill]] }
 0x408   : > { %p1508_p7 = scmp.ge.s32.totalorder %s25_s8, 14   ;;  %s1641_s21 = sld [smem:[#allocation14_spill]] }
 0x409   : > { %s1642_s22 = sld [smem:[#allocation15_spill]]  ;;  %s1653_s18 = smov %s1098_s19 }
 0x40a   : > { %s1643_s23 = sld [smem:[#allocation27_spill]]  ;;  %s1654_s19 = smov %s1102_s20 }
 0x40b   : > { %s1644_s24 = sld [smem:[#allocation16_spill]] }
 0x40c   : > { %s1645_s25 = sld [smem:[#allocation17_spill]] }
 0x40d   : > { %s1646_s26 = sld [smem:[#allocation26_spill]]  ;;  %s1655_s20 = smov %s1640_s5 }
 0x40e   : > { %s1647_s27 = sld [smem:[#allocation20_spill]] }
 0x40f   : > { %s1648_s28 = sld [smem:[#allocation21_spill]]  ;;  %24 = sbr.rel (!%p1508_p7) target bundleno = 20 (0x14), region = 130 }
 0x410   : > { %s1649_s29 = sld [smem:[#allocation22_spill]] }
 0x411   : > { %s1650_s30 = sld [smem:[#allocation23_spill]] }
 0x412   : > { %s1651_s6 = sld [smem:[#allocation24_spill]] }
 0x413   : > { %s1652_s7 = sld [smem:[#allocation25_spill]] }
 0x414   :  { %571 = vsyncpa [#allocation6], 1 }
 0x415   :  { %573 = vsyncpa [#allocation6 + $0x1], 1 }
 0x416   :  { %574 = vsyncpa [#allocation9], 1 }
 0x417   :  { %576 = vsyncpa [#allocation9 + $0x1], 1 }
 0x418   :  { %577 = vsyncpa [#allocation7], 1 }
 0x419   :  { %579 = vsyncpa [#allocation7 + $0x1], 1 }

</bundles_post_ra>
